<compile_context>
chip_gen: v5e
topology: v5e:2x2
jax: 0.10.0
libtpu: 0.0.40
codegen_flags: <defaults>
</compile_context>

<pallas_src>
import jax
import jax.numpy as jnp
from jax.experimental import pallas as pl
from jax.experimental.pallas import tpu as pltpu

_EPS = 1e-12  # F.normalize default eps


def _round_up(n, m):
    return ((n + m - 1) // m) * m


def _normed_linear_kernel(x_ref, w_ref, o_ref):
    x = x_ref[...]                                        # (TB, K) native dtype
    w = w_ref[...]                                        # (K, TN) native dtype

    # Sum-of-squares in f32 for accuracy; reductions run on the XLU.
    xf = x.astype(jnp.float32)
    wf = w.astype(jnp.float32)
    row_ss = jnp.sum(xf * xf, axis=1, keepdims=True)      # (TB, 1)
    col_ss = jnp.sum(wf * wf, axis=0, keepdims=True)      # (1, TN)

    # 1 / max(||.||, eps) == rsqrt(max(ss, eps^2))  -> EUP rsqrt, no sqrt+div.
    row_inv = jax.lax.rsqrt(jnp.maximum(row_ss, _EPS * _EPS))
    col_inv = jax.lax.rsqrt(jnp.maximum(col_ss, _EPS * _EPS))

    # MXU matmul on the un-normalized operands, f32 accumulation.
    out = jnp.dot(x, w, preferred_element_type=jnp.float32)

    # Rank-1 rescale == x/max(||x||,eps) @ w/max(||w||,eps) * 20
    o_ref[...] = (out * (20.0 * row_inv) * col_inv).astype(o_ref.dtype)


def normed_linear(x, weight, *, block_b=256, block_n=256):
    B, K = x.shape
    Kw, N = weight.shape
    assert K == Kw, "in_features mismatch"

    # Tile sizes: multiples of 8 (sublane) / 128 (lane), clipped to the padded
    # problem size so small demo shapes don't over-pad.
    block_b = min(block_b, _round_up(B, 8))
    block_n = min(block_n, _round_up(N, 128))
    B_pad = _round_up(B, block_b)
    N_pad = _round_up(N, block_n)

    # Zero padding keeps the math exact: padded rows/cols produce exact zeros
    # (0 * rsqrt(eps^2) == 0) and are sliced off at the end.
    x_p = jnp.pad(x, ((0, B_pad - B), (0, 0))) if B_pad != B else x
    w_p = jnp.pad(weight, ((0, 0), (0, N_pad - N))) if N_pad != N else weight

    b_tiles = B_pad // block_b
    n_tiles = N_pad // block_n

    xi = jnp.dtype(x.dtype).itemsize
    wi = jnp.dtype(weight.dtype).itemsize
    tile_bytes = 2 * (block_b * K * xi          # x tile (double buffered)
                      + K * block_n * wi        # weight tile
                      + block_b * block_n * xi)  # output tile
    vmem_limit = int(min(max(tile_bytes + (8 << 20), 32 << 20), 100 << 20))

    out = pl.pallas_call(
        _normed_linear_kernel,
        out_shape=jax.ShapeDtypeStruct((B_pad, N_pad), x.dtype),
        grid_spec=pltpu.PrefetchScalarGridSpec(
            num_scalar_prefetch=0,
            grid=(b_tiles, n_tiles),
            in_specs=[
                pl.BlockSpec((block_b, K), lambda i, j: (i, 0)),   # x tile
                pl.BlockSpec((K, block_n), lambda i, j: (0, j)),   # weight tile
            ],
            out_specs=pl.BlockSpec((block_b, block_n), lambda i, j: (i, j)),
        ),
        compiler_params=pltpu.CompilerParams(
            dimension_semantics=("parallel", "parallel"),
            vmem_limit_bytes=vmem_limit),
    )(x_p, w_p)

    return out[:B, :N]


def init_weight(key, in_features, out_features):
    """Mimic: torch.Tensor(in, out).uniform_(-1,1).renorm_(2, 1, 1e-5).mul_(1e5)."""
    w = jax.random.uniform(key, (in_features, out_features),
                           dtype=jnp.float32, minval=-1.0, maxval=1.0)
    # renorm_(p=2, dim=1, maxnorm=1e-5): clamp each column's L2 norm to <= 1e-5
    col_norm = jnp.linalg.norm(w, axis=0, keepdims=True)
    scale = jnp.where(col_norm > 1e-5, 1e-5 / (col_norm + 1e-7), 1.0)
    w = w * scale
    return w * 1e5


if __name__ == "__main__":
    key = jax.random.PRNGKey(0)
    kx, kw = jax.random.split(key)

    batch, in_features, out_features = 8, 32, 16
    x = jax.random.normal(kx, (batch, in_features), dtype=jnp.float32)
    weight = init_weight(kw, in_features, out_features)

    out = normed_linear(x, weight)
    out = jax.block_until_ready(out)

    # Pure-JAX reference check (F.normalize semantics: divide by max(norm, eps)).
    xn = x / jnp.maximum(jnp.linalg.norm(x, axis=1, keepdims=True), _EPS)
    wn = weight / jnp.maximum(jnp.linalg.norm(weight, axis=0, keepdims=True), _EPS)
    ref = xn @ wn * 20.0
    assert out.shape == ref.shape
    assert jnp.allclose(out, ref, atol=1e-4, rtol=1e-4), "mismatch vs reference"

    print("KERNEL_OK")
</pallas_src>

<mosaic_0001>
module attributes {stable_mosaic.version = 11 : i64} {
  func.func @_normed_linear_kernel(%arg0: i32, %arg1: i32, %arg2: memref<8x32xf32, #tpu.memory_space<vmem>>, %arg3: memref<32x128xf32, #tpu.memory_space<vmem>>, %arg4: memref<8x128xf32, #tpu.memory_space<vmem>>) attributes {dimension_semantics = [#tpu.dimension_semantics<parallel>, #tpu.dimension_semantics<parallel>], iteration_bounds = array<i64: 1, 1>, scalar_prefetch = 0 : i64, scratch_operands = 0 : i64, tpu.core_type = #tpu.core_type<tc>, window_params = [{transform_indices = @transform_0, window_bounds = array<i64: 8, 32>}, {transform_indices = @transform_1, window_bounds = array<i64: 32, 128>}, {transform_indices = @transform_2, window_bounds = array<i64: 8, 128>}]} {
    %c0 = arith.constant 0 : index
    %c0_0 = arith.constant 0 : index
    %0 = vector.load %arg2[%c0, %c0_0] : memref<8x32xf32, #tpu.memory_space<vmem>>, vector<8x32xf32>
    %c0_1 = arith.constant 0 : index
    %c0_2 = arith.constant 0 : index
    %1 = vector.load %arg3[%c0_1, %c0_2] : memref<32x128xf32, #tpu.memory_space<vmem>>, vector<32x128xf32>
    %2 = arith.mulf %0, %0 : vector<8x32xf32>
    %cst = arith.constant dense<0.000000e+00> : vector<8xf32>
    %3 = vector.multi_reduction <add>, %2, %cst [1] : vector<8x32xf32> to vector<8xf32>
    %4 = vector.shape_cast %3 : vector<8xf32> to vector<8x1xf32>
    %5 = arith.mulf %1, %1 : vector<32x128xf32>
    %cst_3 = arith.constant dense<0.000000e+00> : vector<128xf32>
    %6 = vector.multi_reduction <add>, %5, %cst_3 [0] : vector<32x128xf32> to vector<128xf32>
    %7 = vector.shape_cast %6 : vector<128xf32> to vector<1x128xf32>
    %cst_4 = arith.constant 1.000000e-24 : f32
    %8 = vector.broadcast %cst_4 : f32 to vector<8x1xf32>
    %9 = arith.maximumf %4, %8 : vector<8x1xf32>
    %10 = math.rsqrt %9 : vector<8x1xf32>
    %cst_5 = arith.constant 1.000000e-24 : f32
    %11 = vector.broadcast %cst_5 : f32 to vector<1x128xf32>
    %12 = arith.maximumf %7, %11 : vector<1x128xf32>
    %13 = math.rsqrt %12 : vector<1x128xf32>
    %cst_6 = arith.constant dense<0.000000e+00> : vector<8x128xf32>
    %14 = tpu.matmul %0, %1, %cst_6 {dimension_numbers = #tpu.dot_dimension_numbers<[1], [0], [0], [1], [0, 0, 1, 1], [], []>} : vector<8x32xf32>, vector<32x128xf32>, vector<8x128xf32> -> vector<8x128xf32>
    %cst_7 = arith.constant 2.000000e+01 : f32
    %15 = vector.broadcast %cst_7 : f32 to vector<8x1xf32>
    %16 = arith.mulf %15, %10 : vector<8x1xf32>
    %17 = vector.broadcast %16 : vector<8x1xf32> to vector<8x128xf32>
    %18 = arith.mulf %14, %17 : vector<8x128xf32>
    %19 = vector.broadcast %13 : vector<1x128xf32> to vector<8x128xf32>
    %20 = arith.mulf %18, %19 : vector<8x128xf32>
    %c0_8 = arith.constant 0 : index
    %c0_9 = arith.constant 0 : index
    %21 = vector.load %arg4[%c0_8, %c0_9] : memref<8x128xf32, #tpu.memory_space<vmem>>, vector<8x128xf32>
    tpu.vector_store %arg4[%c0_8, %c0_9], %20 {strides = array<i32>} : memref<8x128xf32, #tpu.memory_space<vmem>>, vector<8x128xf32>,
    return
  }
  func.func @transform_0(%arg0: i32, %arg1: i32) -> (i32, i32) {
    %c0_i32 = arith.constant 0 : i32
    %c0_i32_0 = arith.constant 0 : i32
    return %arg0, %c0_i32 : i32, i32
  }
  func.func @transform_1(%arg0: i32, %arg1: i32) -> (i32, i32) {
    %c0_i32 = arith.constant 0 : i32
    %c0_i32_0 = arith.constant 0 : i32
    return %c0_i32, %arg1 : i32, i32
  }
  func.func @transform_2(%arg0: i32, %arg1: i32) -> (i32, i32) {
    %c0_i32 = arith.constant 0 : i32
    return %arg0, %arg1 : i32, i32
  }
}

</mosaic_0001>

<bundles_post_ra>
// kernel: tpu_custom_call.1
= control target key start
LH: loop header
LB: loop body
LE: loop exit
PB: predicated region body
PF: predicated region fallthrough
CT: control target
= control target key end

     0   :  { %7 = vsyncpa [#allocation3], 0  ;;  %s251_s0 = inlined_call_operand.hbm [shape: f32[8,32], index: 0, kind: input, shape index: {}]   ;;  %s252_s1 = inlined_call_operand.hbm [shape: f32[32,128], index: 1, kind: input, shape index: {}]   ;;  %s253_s2 = inlined_call_operand.hbm [shape: f32[8,128], index: 2, kind: output, shape index: {}]  }
   0x1   :  { %8 = vsyncpa [#allocation6], 0 }
   0x2   :  { %9 = vsyncpa [#allocation4], 0  ;;  %s15_s11 = sshll.u32 %s251_s0, 4  ;;  %s220_s12 = smov [#allocation2]   ;;  %s16_s11 = int_to_ptr.hbm [resolvable:$true] %s15_s11 }
   0x3   :  { %s17_s13 = sshll.u32 %s220_s12, 4  ;;  %s25_s16 = sshll.u32 %s252_s1, 4  ;;  %s18_s13 = int_to_ptr.vmem [resolvable:$true] %s17_s13  ;;  %s26_s16 = int_to_ptr.hbm [resolvable:$true] %s25_s16 }
   0x4   :  { %20 = dma.hbm_to_vmem [thread:$0]  %s16_s11, 128, %s18_s13, [#allocation3]  }
   0x5   :  { %s221_s17 = smov [#allocation5]   ;;  %s222_s19 = smov 128  }
   0x6   :  { %s27_s18 = sshll.u32 %s221_s17, 4  ;;  %s223_s20 = smov 8   ;;  %s28_s18 = int_to_ptr.vmem [resolvable:$true] %s27_s18 }
   0x7   :  { %33 = dma.hbm_to_vmem [thread:$0]  %s26_s16, 512, %s28_s18, [#allocation6], %s222_s19, %s222_s19, %s223_s20  }
   0x8   :  { %214 = dma.done.wait [#allocation3], 128  }
   0x9   :  { %215 = vsyncadd [#allocation3], 4294967168 }
   0xa   :  { %216 = dma.done.wait [#allocation6], 512  }
   0xb   :  { %217 = vsyncadd [#allocation6], 4294966784  ;;  %v42_v0 = vld [vmem:[#allocation2] sm:$0xff]  ;;  %vm48_vm0 = vcmask 261120   ;;  %v45_v2 = vld [vmem:[#allocation5 + $0x10] sm:$0xff]  ;;  %s224_s0 = smov [#allocation7]  }
   0xc   :  { %v46_v1 = vld [vmem:[#allocation5 + $0x18] sm:$0xff]  ;;  %v47_v3 = vmul.f32 %v42_v0, %v42_v0  ;;  %v44_v4 = vld [vmem:[#allocation5 + $0x8] sm:$0xff]  ;;  %v43_v5 = vld [vmem:[#allocation5] sm:$0xff]  ;;  %v54_v6 = vmul.f32 %v45_v2, %v45_v2  ;;  %s119_s1 = sshll.u32 %s224_s0, 4  ;;  %s121_s23 = sshll.u32 %s253_s2, 4  ;;  %s120_s1 = int_to_ptr.vmem [resolvable:$true] %s119_s1  ;;  %s122_s23 = int_to_ptr.hbm [resolvable:$true] %s121_s23 }
   0xd   :  { %102 = vmatpush.msra.mxu0 %v46_v1  ;;  %v53_v7 = vmul.f32 %v44_v4, %v44_v4  ;;  %v52_v8 = vmul.f32 %v43_v5, %v43_v5  ;;  %v55_v10 = vmul.f32 %v46_v1, %v46_v1 }
   0xe   :  { %v49_v9 = vsel %vm48_vm0, %v47_v3, 0.0 }
   0xf   :  { %103 = vmatpush.msra.mxu0 %v45_v2  ;;  %50 = vadd.xlane.f32.xlu0 %v49_v9  ;;  %v56_v11 = vadd.f32 %v53_v7, %v52_v8 }
  0x11   :  { %104 = vmatpush.msra.mxu0 %v44_v4  ;;  %v57_v12 = vadd.f32 %v56_v11, %v54_v6 }
  0x13   :  { %105 = vmatpush.msra.mxu0 %v43_v5  ;;  %v58_v13 = vadd.f32 %v57_v12, %v55_v10 }
  0x14   :  { %132 = vmatmul.msk.f32.vlgmr.msra.gmra.mxu0 %vm48_vm0, %v42_v0 }
  0x15   :  { %v59_v14 = vrot.slane %v58_v13, 4 }
  0x17   :  { %v60_v15 = vadd.f32 %v59_v14, %v58_v13 }
  0x19   :  { %v61_v16 = vrot.slane %v60_v15, 2 }
  0x1b   :  { %v62_v17 = vadd.f32 %v61_v16, %v60_v15 }
  0x1d   :  { %v63_v18 = vrot.slane %v62_v17, 1 }
  0x1f   :  { %v64_v19 = vadd.f32 %v63_v18, %v62_v17 }
  0x21   :  { %v76_v20 = vmax.f32 %v64_v19, 1e-24 }
  0x23   :  { %138 = vrsqrt.f32 %v76_v20  ;;  %vm83_vm1 = vweird.f32 %v76_v20 }
  0x29   :  { %v139_v21 = vpop.eup %138 }
  0x2a   :  { %v78_v24 = vmul.f32 %v139_v21, %v76_v20  ;;  %vm84_vm2 = vweird.f32 %v139_v21 }
  0x2b   :  { %vm85_vm5 = vmor %vm83_vm1, %vm84_vm2 }
  0x2c   :  { %v79_v25 = vmul.f32 %v139_v21, %v78_v24 }
  0x2e   :  { %v80_v28 = vmul.f32 0.5, %v79_v25 }
  0x30   :  { %v81_v31 = vsub.f32 1.5, %v80_v28 }
  0x32   :  { %v82_v34 = vmul.f32 %v139_v21, %v81_v31 }
  0x34   :  { %v86_v38 = vsel %vm85_vm5, %v139_v21, %v82_v34 }
  0x82   :  { %v51_v22 = vpop.xlane.xlu0 %50 }
  0x83   :  { %v65_v23 = vmax.f32 %v51_v22, 1e-24 }
  0x85   :  { %140 = vrsqrt.f32 %v65_v23  ;;  %vm72_vm4 = vweird.f32 %v65_v23 }
  0x8b   :  { %v141_v26 = vpop.eup %140 }
  0x8c   :  { %v67_v27 = vmul.f32 %v141_v26, %v65_v23  ;;  %vm73_vm3 = vweird.f32 %v141_v26 }
  0x8d   :  { %vm74_vm6 = vmor %vm72_vm4, %vm73_vm3 }
  0x8e   :  { %v68_v29 = vmul.f32 %v141_v26, %v67_v27 }
  0x90   :  { %v69_v30 = vmul.f32 0.5, %v68_v29 }
  0x91   :  { %v107_v36 = vpop.f32.mrf.mxu0 }
  0x92   :  { %v70_v32 = vsub.f32 1.5, %v69_v30 }
  0x94   :  { %v71_v33 = vmul.f32 %v141_v26, %v70_v32 }
  0x96   :  { %v75_v35 = vsel %vm74_vm6, %v141_v26, %v71_v33 }
  0x97   :  { %v110_v37 = vmul.f32 20.0, %v75_v35 }
  0x99   :  { %v111_v39 = vmul.f32 %v110_v37, %v107_v36 }
  0x9b   :  { %v112_v40 = vmul.f32 %v111_v39, %v86_v38 }
  0x9d   :  { %113 = vst [vmem:[#allocation7] sm:$0xff] %v112_v40 }
  0x9e   :  { %124 = dma.vmem_to_hbm [thread:$0]  %s120_s1, 128, %s122_s23, [#allocation4]  }
  0x9f   :  { %218 = dma.done.wait [#allocation4], 128  }
  0xa0   :  { %219 = vsyncadd [#allocation4], 4294967168 }
  0xa1   :  { %129 = vsyncpa [#allocation3], 1 }
  0xa2   :  { %130 = vsyncpa [#allocation6], 1 }
  0xa3   :  { %131 = vsyncpa [#allocation4], 1 }

</bundles_post_ra>
